<compile_context>
chip_gen: v6e
topology: v6e:2x2x1
jax: 0.10.0
libtpu: 0.0.40
codegen_flags: <defaults>
</compile_context>

<pallas_src>
import jax
import jax.numpy as jnp
import numpy as np
from jax.experimental import pallas as pl
from jax.experimental.pallas import tpu as pltpu

LOG_SIG_MAX = 2.0
LOG_SIG_MIN = -20.0


def _policy_kernel(state_ref, w1_ref, b12_ref, w2_ref, wh_ref, bh_ref,
                   mean_ref, log_std_ref):
    # layer 1: relu(x @ W1 + b1)
    x = jnp.dot(state_ref[...], w1_ref[...],
                preferred_element_type=jnp.float32) + b12_ref[0:1, :]
    x = jnp.maximum(x, 0.0)

    # layer 2: relu(x @ W2 + b2)
    x = jnp.dot(x, w2_ref[...],
                preferred_element_type=jnp.float32) + b12_ref[1:2, :]
    x = jnp.maximum(x, 0.0)

    # fused heads: [mean | log_std] = x @ [Wm | Ws] + [bm | bs]
    h = jnp.dot(x, wh_ref[...],
                preferred_element_type=jnp.float32) + bh_ref[...]

    a = mean_ref.shape[1]
    mean_ref[...] = h[:, :a]
    log_std_ref[...] = jnp.clip(h[:, a:], LOG_SIG_MIN, LOG_SIG_MAX)


def _pick_batch_tile(batch, max_tile=256):
    """Largest batch tile <= max_tile that tiles B legally ((8,128) rule)."""
    if batch <= max_tile:
        return batch                      # full-dim block: always legal
    for t in (256, 128, 64, 32, 16, 8):   # multiples of 8
        if batch % t == 0:
            return t
    return batch                          # fall back to whole array


@jax.jit
def gaussian_policy_forward(state, params):
    """Pallas implementation of GaussianPolicy.forward(state) -> (mean, log_std)."""
    w1, b12 = params["w1"], params["b12"]
    w2 = params["w2"]
    wh, bh = params["head_w"], params["head_b"]

    batch, num_inputs = state.shape
    hidden = w1.shape[1]
    two_a = wh.shape[1]
    a = two_a // 2

    tb = _pick_batch_tile(batch)
    grid = (pl.cdiv(batch, tb),)

    pin = lambda shape: pl.BlockSpec(shape, lambda i: (0, 0))

    mean, log_std = pl.pallas_call(
        _policy_kernel,
        out_shape=(jax.ShapeDtypeStruct((batch, a), jnp.float32),
                   jax.ShapeDtypeStruct((batch, a), jnp.float32)),
        grid=grid,
        in_specs=[
            pl.BlockSpec((tb, num_inputs), lambda i: (i, 0)),   # state (tiled on B)
            pin((num_inputs, hidden)),                          # W1
            pin((2, hidden)),                                   # [b1; b2]
            pin((hidden, hidden)),                              # W2
            pin((hidden, two_a)),                               # [Wm | Ws]
            pin((1, two_a)),                                    # [bm | bs]
        ],
        out_specs=(pl.BlockSpec((tb, a), lambda i: (i, 0)),
                   pl.BlockSpec((tb, a), lambda i: (i, 0))),
        compiler_params=pltpu.CompilerParams(
            dimension_semantics=("parallel",)),
    )(state, w1, b12, w2, wh, bh)

    return mean, log_std


# ----------------------- parameter construction (glue) -----------------------

def _xavier_uniform(key, fan_out, fan_in):
    # matches torch.nn.init.xavier_uniform_(weight, gain=1) for an (out, in) Linear
    limit = float(np.sqrt(6.0 / (fan_in + fan_out)))
    return jax.random.uniform(key, (fan_out, fan_in), jnp.float32, -limit, limit)


def _bias(key, fan_in, n):
    # torch nn.Linear default bias init: U(-1/sqrt(fan_in), 1/sqrt(fan_in))
    bound = float(1.0 / np.sqrt(fan_in))
    return jax.random.uniform(key, (1, n), jnp.float32, -bound, bound)


def init_params(key, num_inputs, num_actions, hidden_dim):
    keys = jax.random.split(key, 8)
    w1 = _xavier_uniform(keys[0], hidden_dim, num_inputs).T       # [in, hidden]
    b1 = _bias(keys[1], num_inputs, hidden_dim)
    w2 = _xavier_uniform(keys[2], hidden_dim, hidden_dim).T       # [hidden, hidden]
    b2 = _bias(keys[3], hidden_dim, hidden_dim)
    mean_w = _xavier_uniform(keys[4], num_actions, hidden_dim).T  # [hidden, A]
    mean_b = _bias(keys[5], hidden_dim, num_actions)
    logstd_w = _xavier_uniform(keys[6], num_actions, hidden_dim).T
    logstd_b = _bias(keys[7], hidden_dim, num_actions)

    # offline packing (done once, outside the jitted forward):
    #   head fusion: single [hidden, 2A] weight and [1, 2A] bias
    #   bias packing: b1/b2 into one [2, hidden] buffer
    head_w = jnp.concatenate([mean_w, logstd_w], axis=1)
    head_b = jnp.concatenate([mean_b, logstd_b], axis=1)
    b12 = jnp.concatenate([b1, b2], axis=0)

    return {
        "w1": w1, "b12": b12, "w2": w2,
        "head_w": head_w, "head_b": head_b,
        # kept only for the f32 reference check
        "b1": b1, "b2": b2,
        "mean_w": mean_w, "mean_b": mean_b,
        "logstd_w": logstd_w, "logstd_b": logstd_b,
    }


def _reference_forward(state, params):
    x = jnp.maximum(state @ params["w1"] + params["b1"], 0.0)
    x = jnp.maximum(x @ params["w2"] + params["b2"], 0.0)
    mean = x @ params["mean_w"] + params["mean_b"]
    log_std = jnp.clip(x @ params["logstd_w"] + params["logstd_b"],
                       LOG_SIG_MIN, LOG_SIG_MAX)
    return mean, log_std


if __name__ == "__main__":
    key = jax.random.PRNGKey(0)
    k_param, k_state = jax.random.split(key)

    batch = 8
    num_inputs = 32
    num_actions = 8
    hidden_dim = 64

    params = init_params(k_param, num_inputs, num_actions, hidden_dim)
    state = jax.random.normal(k_state, (batch, num_inputs), jnp.float32)

    mean, log_std = gaussian_policy_forward(state, params)
    jax.block_until_ready((mean, log_std))

    # f32 end-to-end now -> tight tolerance.
    ref_mean, ref_log_std = _reference_forward(state, params)
    np.testing.assert_allclose(np.asarray(mean), np.asarray(ref_mean),
                               rtol=1e-4, atol=1e-4)
    np.testing.assert_allclose(np.asarray(log_std), np.asarray(ref_log_std),
                               rtol=1e-4, atol=1e-4)

    # TODO(synk): GaussianPolicy.sample() (Normal.rsample + tanh squash) is not
    # part of forward(); not implemented as a kernel here.
    print("KERNEL_OK")
</pallas_src>

<mosaic_0001>
module attributes {stable_mosaic.version = 11 : i64} {
  func.func @_policy_kernel(%arg0: i32, %arg1: memref<8x32xf32, #tpu.memory_space<vmem>>, %arg2: memref<32x64xf32, #tpu.memory_space<vmem>>, %arg3: memref<2x64xf32, #tpu.memory_space<vmem>>, %arg4: memref<64x64xf32, #tpu.memory_space<vmem>>, %arg5: memref<64x16xf32, #tpu.memory_space<vmem>>, %arg6: memref<1x16xf32, #tpu.memory_space<vmem>>, %arg7: memref<8x8xf32, #tpu.memory_space<vmem>>, %arg8: memref<8x8xf32, #tpu.memory_space<vmem>>) attributes {dimension_semantics = [#tpu.dimension_semantics<parallel>], iteration_bounds = array<i64: 1>, scalar_prefetch = 0 : i64, scratch_operands = 0 : i64, tpu.core_type = #tpu.core_type<tc>, window_params = [{transform_indices = @transform_0, window_bounds = array<i64: 8, 32>}, {pipeline_mode = #tpu.pipeline_mode<synchronous>, transform_indices = @transform_1, window_bounds = array<i64: 32, 64>}, {pipeline_mode = #tpu.pipeline_mode<synchronous>, transform_indices = @transform_2, window_bounds = array<i64: 2, 64>}, {pipeline_mode = #tpu.pipeline_mode<synchronous>, transform_indices = @transform_3, window_bounds = array<i64: 64, 64>}, {pipeline_mode = #tpu.pipeline_mode<synchronous>, transform_indices = @transform_4, window_bounds = array<i64: 64, 16>}, {pipeline_mode = #tpu.pipeline_mode<synchronous>, transform_indices = @transform_5, window_bounds = array<i64: 1, 16>}, {transform_indices = @transform_6, window_bounds = array<i64: 8, 8>}, {transform_indices = @transform_7, window_bounds = array<i64: 8, 8>}]} {
    %c0 = arith.constant 0 : index
    %c0_0 = arith.constant 0 : index
    %0 = vector.load %arg1[%c0, %c0_0] : memref<8x32xf32, #tpu.memory_space<vmem>>, vector<8x32xf32>
    %c0_1 = arith.constant 0 : index
    %c0_2 = arith.constant 0 : index
    %1 = vector.load %arg2[%c0_1, %c0_2] : memref<32x64xf32, #tpu.memory_space<vmem>>, vector<32x64xf32>
    %cst = arith.constant dense<0.000000e+00> : vector<8x64xf32>
    %2 = tpu.matmul %0, %1, %cst {dimension_numbers = #tpu.dot_dimension_numbers<[1], [0], [0], [1], [0, 0, 1, 1], [], []>} : vector<8x32xf32>, vector<32x64xf32>, vector<8x64xf32> -> vector<8x64xf32>
    %c0_3 = arith.constant 0 : index
    %c0_4 = arith.constant 0 : index
    %3 = vector.load %arg3[%c0_3, %c0_4] : memref<2x64xf32, #tpu.memory_space<vmem>>, vector<1x64xf32>
    %4 = vector.broadcast %3 : vector<1x64xf32> to vector<8x64xf32>
    %5 = arith.addf %2, %4 : vector<8x64xf32>
    %cst_5 = arith.constant 0.000000e+00 : f32
    %6 = vector.broadcast %cst_5 : f32 to vector<8x64xf32>
    %7 = arith.maximumf %5, %6 : vector<8x64xf32>
    %c0_6 = arith.constant 0 : index
    %c0_7 = arith.constant 0 : index
    %8 = vector.load %arg4[%c0_6, %c0_7] : memref<64x64xf32, #tpu.memory_space<vmem>>, vector<64x64xf32>
    %cst_8 = arith.constant dense<0.000000e+00> : vector<8x64xf32>
    %9 = tpu.matmul %7, %8, %cst_8 {dimension_numbers = #tpu.dot_dimension_numbers<[1], [0], [0], [1], [0, 0, 1, 1], [], []>} : vector<8x64xf32>, vector<64x64xf32>, vector<8x64xf32> -> vector<8x64xf32>
    %c1 = arith.constant 1 : index
    %c0_9 = arith.constant 0 : index
    %10 = vector.load %arg3[%c1, %c0_9] : memref<2x64xf32, #tpu.memory_space<vmem>>, vector<1x64xf32>
    %11 = vector.broadcast %10 : vector<1x64xf32> to vector<8x64xf32>
    %12 = arith.addf %9, %11 : vector<8x64xf32>
    %cst_10 = arith.constant 0.000000e+00 : f32
    %13 = vector.broadcast %cst_10 : f32 to vector<8x64xf32>
    %14 = arith.maximumf %12, %13 : vector<8x64xf32>
    %c0_11 = arith.constant 0 : index
    %c0_12 = arith.constant 0 : index
    %15 = vector.load %arg5[%c0_11, %c0_12] : memref<64x16xf32, #tpu.memory_space<vmem>>, vector<64x16xf32>
    %cst_13 = arith.constant dense<0.000000e+00> : vector<8x16xf32>
    %16 = tpu.matmul %14, %15, %cst_13 {dimension_numbers = #tpu.dot_dimension_numbers<[1], [0], [0], [1], [0, 0, 1, 1], [], []>} : vector<8x64xf32>, vector<64x16xf32>, vector<8x16xf32> -> vector<8x16xf32>
    %c0_14 = arith.constant 0 : index
    %c0_15 = arith.constant 0 : index
    %17 = vector.load %arg6[%c0_14, %c0_15] : memref<1x16xf32, #tpu.memory_space<vmem>>, vector<1x16xf32>
    %18 = vector.broadcast %17 : vector<1x16xf32> to vector<8x16xf32>
    %19 = arith.addf %16, %18 : vector<8x16xf32>
    %20 = vector.extract_strided_slice %19 {offsets = [0, 0], sizes = [8, 8], strides = [1, 1]} : vector<8x16xf32> to vector<8x8xf32>
    %c0_16 = arith.constant 0 : index
    %c0_17 = arith.constant 0 : index
    %21 = vector.load %arg7[%c0_16, %c0_17] : memref<8x8xf32, #tpu.memory_space<vmem>>, vector<8x8xf32>
    tpu.vector_store %arg7[%c0_16, %c0_17], %20 {strides = array<i32>} : memref<8x8xf32, #tpu.memory_space<vmem>>, vector<8x8xf32>,
    %22 = vector.extract_strided_slice %19 {offsets = [0, 8], sizes = [8, 8], strides = [1, 1]} : vector<8x16xf32> to vector<8x8xf32>
    %cst_18 = arith.constant -2.000000e+01 : f32
    %cst_19 = arith.constant 2.000000e+00 : f32
    %23 = vector.broadcast %cst_18 : f32 to vector<8x8xf32>
    %24 = arith.maximumf %23, %22 : vector<8x8xf32>
    %25 = vector.broadcast %cst_19 : f32 to vector<8x8xf32>
    %26 = arith.minimumf %25, %24 : vector<8x8xf32>
    %c0_20 = arith.constant 0 : index
    %c0_21 = arith.constant 0 : index
    %27 = vector.load %arg8[%c0_20, %c0_21] : memref<8x8xf32, #tpu.memory_space<vmem>>, vector<8x8xf32>
    tpu.vector_store %arg8[%c0_20, %c0_21], %26 {strides = array<i32>} : memref<8x8xf32, #tpu.memory_space<vmem>>, vector<8x8xf32>,
    return
  }
  func.func @transform_0(%arg0: i32) -> (i32, i32) {
    %c0_i32 = arith.constant 0 : i32
    %c0_i32_0 = arith.constant 0 : i32
    return %arg0, %c0_i32 : i32, i32
  }
  func.func @transform_1(%arg0: i32) -> (i32, i32) {
    %c0_i32 = arith.constant 0 : i32
    %c0_i32_0 = arith.constant 0 : i32
    %c0_i32_1 = arith.constant 0 : i32
    return %c0_i32, %c0_i32_0 : i32, i32
  }
  func.func @transform_2(%arg0: i32) -> (i32, i32) {
    %c0_i32 = arith.constant 0 : i32
    %c0_i32_0 = arith.constant 0 : i32
    %c0_i32_1 = arith.constant 0 : i32
    return %c0_i32, %c0_i32_0 : i32, i32
  }
  func.func @transform_3(%arg0: i32) -> (i32, i32) {
    %c0_i32 = arith.constant 0 : i32
    %c0_i32_0 = arith.constant 0 : i32
    %c0_i32_1 = arith.constant 0 : i32
    return %c0_i32, %c0_i32_0 : i32, i32
  }
  func.func @transform_4(%arg0: i32) -> (i32, i32) {
    %c0_i32 = arith.constant 0 : i32
    %c0_i32_0 = arith.constant 0 : i32
    %c0_i32_1 = arith.constant 0 : i32
    return %c0_i32, %c0_i32_0 : i32, i32
  }
  func.func @transform_5(%arg0: i32) -> (i32, i32) {
    %c0_i32 = arith.constant 0 : i32
    %c0_i32_0 = arith.constant 0 : i32
    %c0_i32_1 = arith.constant 0 : i32
    return %c0_i32, %c0_i32_0 : i32, i32
  }
  func.func @transform_6(%arg0: i32) -> (i32, i32) {
    %c0_i32 = arith.constant 0 : i32
    %c0_i32_0 = arith.constant 0 : i32
    return %arg0, %c0_i32 : i32, i32
  }
  func.func @transform_7(%arg0: i32) -> (i32, i32) {
    %c0_i32 = arith.constant 0 : i32
    %c0_i32_0 = arith.constant 0 : i32
    return %arg0, %c0_i32 : i32, i32
  }
}

</mosaic_0001>

<bundles_post_ra>
// kernel: gaussian_policy_forward.1
= control target key start
LH: loop header
LB: loop body
LE: loop exit
PB: predicated region body
PF: predicated region fallthrough
CT: control target
= control target key end

     0   :  { %13 = vsyncpa [#allocation3], 0  ;;  %s639_s0 = inlined_call_operand.vmem [shape: f32[8,32], index: 0, kind: input, shape index: {}]   ;;  %s640_s1 = inlined_call_operand.hbm [shape: f32[32,64], index: 1, kind: input, shape index: {}]   ;;  %s641_s2 = inlined_call_operand.vmem [shape: f32[2,64], index: 2, kind: input, shape index: {}]   ;;  %s642_s3 = inlined_call_operand.vmem [shape: f32[64,64], index: 3, kind: input, shape index: {}]   ;;  %s643_s4 = inlined_call_operand.vmem [shape: f32[64,16], index: 4, kind: input, shape index: {}]   ;;  %s644_s5 = inlined_call_operand.vmem [shape: f32[1,16], index: 5, kind: input, shape index: {}]   ;;  %s645_s6 = inlined_call_operand.hbm [shape: f32[8,8], index: 6, kind: output, shape index: {0}]   ;;  %s646_s7 = inlined_call_operand.hbm [shape: f32[8,8], index: 7, kind: output, shape index: {1}]  }
   0x1   :  { %14 = vsyncpa [#allocation4], 0 }
   0x2   :  { %15 = vsyncpa [#allocation7], 0  ;;  %s492_s24 = smov [#allocation2]  }
   0x3   :  { %s23_s25 = sshll.u32 %s492_s24, 4  ;;  %s24_s25 = int_to_ptr.vmem [resolvable:$true] %s23_s25 }
   0x4   :  { %s434_s26 = scalar_lea.vmem %s24_s25, 512  ;;  %p439_p1 = scmp.lt.s32.totalorder %s24_s25, %s24_s25 }
   0x5   :  { %p435_p0 = scmp.ne.s32.totalorder %s24_s25, %s434_s26  ;;  %p440_p2 = scmp.lt.s32.totalorder %s434_s26, %s434_s26 }
   0x7   :  { %p441_p3 = por %p440_p2, %p439_p1 }
   0x9   :  { %p442_p4 = pnand %p441_p3, %p435_p0 }
   0xb   :  { %445 = shalt.err (!%p442_p4)
}
   0xc   :  { %s493_s27 = smov 128   ;;  %s494_s28 = smov 8  }
   0xd   :  { %29 = dma.hbm_to_vmem [thread:$0]  %s640_s1, 512, %s24_s25, [#allocation3], %s493_s27, %s493_s27, %s494_s28  }
   0xe   :  { %486 = dma.done.wait [#allocation3], 512  }
   0xf   :  { %487 = vsyncadd [#allocation3], 4294966784  ;;  %v495_v0 = vmov 0.0   ;;  %vm496_vm0 = vmmov 0   ;;  %v45_v1 = vld [vmem:[#allocation2 + $0x18] sm:$0xff]  ;;  %v44_v2 = vld [vmem:[#allocation2 + $0x10] sm:$0xff] }
  0x10   :  { %369 = vmatprep.subr.mxu0 %v495_v0  ;;  %377 = vmatprep.mubr.msk.f32.mxu0 %vm496_vm0, %v495_v0  ;;  %v133_v3 = vld [vmem:[%s642_s3 + $0x38] sm:$0xff]  ;;  %v43_v4 = vld [vmem:[#allocation2 + $0x8] sm:$0xff]  ;;  %v132_v5 = vld [vmem:[%s642_s3 + $0x30] sm:$0xff]  ;;  %vm51_vm1 = vcmask 261120   ;;  %vm139_vm2 = vcmask 523264   ;;  %s497_s20 = smov [#allocation5]  }
  0x11   :  { %380 = vmatprep.subr.mxu1 %v495_v0  ;;  %396 = vmatprep.mubr.msk.f32.mxu1 %vm496_vm0, %v495_v0  ;;  %v131_v6 = vld [vmem:[%s642_s3 + $0x28] sm:$0xff]  ;;  %v42_v7 = vld [vmem:[#allocation2] sm:$0xff]  ;;  %v129_v10 = vld [vmem:[%s642_s3 + $0x18] sm:$0xff]  ;;  %s317_s21 = sshll.u32 %s497_s20, 4  ;;  %vm302_vm3 = vcmask 64512   ;;  %s318_s21 = int_to_ptr.vmem [resolvable:$true] %s317_s21 }
  0x12   :  { %370 = vmatpush3.msra.mxu0 %v45_v1  ;;  %381 = vmatpush3.msra.mxu1 %v133_v3  ;;  %v41_v8 = vld [vmem:[%s639_s0] sm:$0xff]  ;;  %v128_v11 = vld [vmem:[%s642_s3 + $0x10] sm:$0xff]  ;;  %v127_v12 = vld [vmem:[%s642_s3 + $0x8] sm:$0xff]  ;;  %p451_p6 = scmp.lt.s32.totalorder %s318_s21, %s318_s21 }
  0x13   :  { %371 = vmatprep.subr.mxu0 %v495_v0  ;;  %382 = vmatprep.subr.mxu1 %v495_v0  ;;  %v130_v9 = vld [vmem:[%s642_s3 + $0x20] sm:$0xff]  ;;  %v221_v14 = vld [vmem:[%s643_s4 + $0x38] sm:$0xff]  ;;  %v220_v15 = vld [vmem:[%s643_s4 + $0x30] sm:$0xff] }
  0x14   :  { %372 = vmatpush3.msra.mxu0 %v44_v2  ;;  %383 = vmatpush3.msra.mxu1 %v132_v5  ;;  %v126_v13 = vld [vmem:[%s642_s3] sm:$0xff]  ;;  %v219_v16 = vld [vmem:[%s643_s4 + $0x28] sm:$0xff]  ;;  %v217_v18 = vld [vmem:[%s643_s4 + $0x18] sm:$0xff] }
  0x15   :  { %373 = vmatprep.subr.mxu0 %v495_v0  ;;  %384 = vmatprep.subr.mxu1 %v495_v0  ;;  %v218_v17 = vld [vmem:[%s643_s4 + $0x20] sm:$0xff]  ;;  %v216_v24 = vld [vmem:[%s643_s4 + $0x10] sm:$0xff]  ;;  %v215_v25 = vld [vmem:[%s643_s4 + $0x8] sm:$0xff] }
  0x16   :  { %374 = vmatpush3.msra.mxu0 %v43_v4  ;;  %385 = vmatpush3.msra.mxu1 %v131_v6  ;;  %v340_v19 = vld [vmem:[%s641_s2] ss:$0 sm:$0xff]  ;;  %v342_v27 = vld [vmem:[%s641_s2 + $0x1] ss:$0 sm:$0xff]  ;;  %s446_s2 = scalar_lea.vmem %s318_s21, 128 }
  0x17   :  { %375 = vmatprep.subr.mxu0 %v495_v0  ;;  %386 = vmatprep.subr.mxu1 %v495_v0  ;;  %v214_v26 = vld [vmem:[%s643_s4] sm:$0xff]  ;;  %p447_p5 = scmp.ne.s32.totalorder %s318_s21, %s446_s2  ;;  %p452_p7 = scmp.lt.s32.totalorder %s446_s2, %s446_s2 }
  0x18   :  { %376 = vmatpush3.msra.mxu0 %v42_v7  ;;  %387 = vmatpush3.msra.mxu1 %v130_v9  ;;  %v344_v32 = vld [vmem:[%s644_s5] ss:$0 sm:$0xff] }
  0x19   :  { %378 = vmatmul.mubr.msk.f32.vlgmr.msra.gmra.mxu0 %vm51_vm1, %v41_v8  ;;  %388 = vmatprep.subr.mxu1 %v495_v0  ;;  %p453_p8 = por %p452_p7, %p451_p6 }
  0x1a   :  { %399 = vmatprep.subr.mxu0 %v495_v0  ;;  %389 = vmatpush3.msra.mxu1 %v129_v10 }
  0x1b   :  { %415 = vmatprep.mubr.msk.f32.mxu0 %vm496_vm0, %v495_v0  ;;  %390 = vmatprep.subr.mxu1 %v495_v0  ;;  %p454_p9 = pnand %p453_p8, %p447_p5 }
  0x1c   :  { %391 = vmatpush3.msra.mxu1 %v128_v11  ;;  %400 = vmatpush3.msra.mxu0 %v221_v14 }
  0x1d   :  { %392 = vmatprep.subr.mxu1 %v495_v0  ;;  %401 = vmatprep.subr.mxu0 %v495_v0 }
  0x1e   :  { %393 = vmatpush3.msra.mxu1 %v127_v12  ;;  %402 = vmatpush3.msra.mxu0 %v220_v15 }
  0x1f   :  { %394 = vmatprep.subr.mxu1 %v495_v0  ;;  %403 = vmatprep.subr.mxu0 %v495_v0 }
  0x20   :  { %395 = vmatpush3.msra.mxu1 %v126_v13  ;;  %404 = vmatpush3.msra.mxu0 %v219_v16 }
  0x21   :  { %405 = vmatprep.subr.mxu0 %v495_v0 }
  0x22   :  { %406 = vmatpush3.msra.mxu0 %v218_v17 }
  0x23   :  { %407 = vmatprep.subr.mxu0 %v495_v0 }
  0x24   :  { %408 = vmatpush3.msra.mxu0 %v217_v18 }
  0x25   :  { %409 = vmatprep.subr.mxu0 %v495_v0 }
  0x26   :  { %410 = vmatpush3.msra.mxu0 %v216_v24 }
  0x27   :  { %411 = vmatprep.subr.mxu0 %v495_v0 }
  0x28   :  { %412 = vmatpush3.msra.mxu0 %v215_v25 }
  0x29   :  { %413 = vmatprep.subr.mxu0 %v495_v0 }
  0x2a   :  { %414 = vmatpush3.msra.mxu0 %v214_v26 }
  0xd9   :  { %v121_v20 = vpop.f32.mrf.mxu0 }
  0xda   :  { %v122_v21 = vadd.f32 %v340_v19, %v121_v20 }
  0xdb   :  { %v379_v22 = vpop.f32.mrf.mxu0 }
  0xdc   :  { %v125_v23 = vmax.f32 %v122_v21, 0.0 }
  0xde   :  { %397 = vmatmul.mubr.msk.f32.vlgmr.msra.gmra.mxu1 %vm139_vm2, %v125_v23 }
 0x19e   :  { %v209_v28 = vpop.f32.mrf.mxu1 }
 0x19f   :  { %v210_v29 = vadd.f32 %v342_v27, %v209_v28 }
 0x1a0   :  { %v398_v30 = vpop.f32.mrf.mxu1 }
 0x1a1   :  { %v213_v31 = vmax.f32 %v210_v29, 0.0 }
 0x1a3   :  { %416 = vmatmul.mubr.msk.f32.vlgmr.msra.gmra.mxu0 %vm139_vm2, %v213_v31 }
 0x263   :  { %v298_v33 = vpop.f32.mrf.mxu0 }
 0x264   :  { %v299_v34 = vadd.f32 %v344_v32, %v298_v33 }
 0x265   :  { %v417_v35 = vpop.f32.mrf.mxu0 }
 0x266   :  { %v304_v36 = vmax.f32 %v299_v34, -20.0  ;;  %303 = vst.msk [vmem:[#allocation5] sm:$0xff] %vm302_vm3, %v299_v34 }
 0x267   :  { %457 = shalt.err (!%p454_p9)
}
 0x268   :  { %320 = dma.vmem_to_hbm [thread:$0]  %s318_s21, 128, %s645_s6, [#allocation4]   ;;  %v305_v37 = vmin.f32 %v304_v36, 2.0 }
 0x269   :  { %s498_s5 = smov 120   ;;  %s499_s23 = smov [#allocation6]  }
 0x26a   :  { %307 = vrot.lane.b32.xlu0 %v305_v37, %s498_s5  ;;  %s327_s24 = sshll.u32 %s499_s23, 4  ;;  %s328_s24 = int_to_ptr.vmem [resolvable:$true] %s327_s24 }
 0x26b   :  { %s466_s25 = scalar_lea.vmem %s328_s24, 128  ;;  %p471_p11 = scmp.lt.s32.totalorder %s328_s24, %s328_s24 }
 0x26c   :  { %p467_p10 = scmp.ne.s32.totalorder %s328_s24, %s466_s25  ;;  %p472_p12 = scmp.lt.s32.totalorder %s466_s25, %s466_s25 }
 0x26e   :  { %p473_p13 = por %p472_p12, %p471_p11 }
 0x270   :  { %p474_p0 = pnand %p473_p13, %p467_p10 }
 0x2dc   :  { %v308_v38 = vpop.permute.xlu0 %307 }
 0x2dd   :  { %310 = vst.msk [vmem:[#allocation6] sm:$0xff] %vm302_vm3, %v308_v38 }
 0x2de   :  { %477 = shalt.err (!%p474_p0)
}
 0x2df   :  { %330 = dma.vmem_to_hbm [thread:$0]  %s328_s24, 128, %s646_s7, [#allocation7]  }
 0x2e0   :  { %488 = dma.done.wait [#allocation4], 128  }
 0x2e1   :  { %489 = vsyncadd [#allocation4], 4294967168 }
 0x2e2   :  { %490 = dma.done.wait [#allocation7], 128  }
 0x2e3   :  { %491 = vsyncadd [#allocation7], 4294967168 }
 0x2e4   :  { %337 = vsyncpa [#allocation3], 1 }
 0x2e5   :  { %338 = vsyncpa [#allocation4], 1 }
 0x2e6   :  { %339 = vsyncpa [#allocation7], 1 }

</bundles_post_ra>
